<compile_context>
chip_gen: v7x
topology: tpu7x:2x2x1
jax: 0.10.0
libtpu: 0.0.40
codegen_flags: <defaults>
</compile_context>

<pallas_src>
import functools

import jax
import jax.numpy as jnp
from jax.experimental import pallas as pl
from jax.experimental.pallas import tpu as pltpu


def _round_up(x, m):
    return ((x + m - 1) // m) * m


def _num_tensorcores():
    # 2-way core split only helps megacore parts (v4 / v5p / v7x); v5e & v6e have 1 TC.
    try:
        kind = jax.devices()[0].device_kind.lower()
    except Exception:
        return 1
    if "lite" in kind or "v5e" in kind or "v6e" in kind:
        return 1
    return 2


def _nll_loss_kernel(pred_ref, lane_ref, out_ref, acc_ref, *, k, tiles_per_core):
    # pred_ref: (TB, W) packed log-prob tile (W = k*C, lane-dense)
    # lane_ref: (TB, k) int32 target lane indices (-1 for padded samples)
    # out_ref : (8, 128) per-core partial sum (scalar broadcast over the block)
    # acc_ref : (TB, W) f32 resident accumulator; reduced only in the epilogue
    t = pl.program_id(1)

    @pl.when(t == 0)
    def _():
        acc_ref[...] = jnp.zeros_like(acc_ref)

    pred = pred_ref[...].astype(jnp.float32)                       # f32 accumulation
    col = jax.lax.broadcasted_iota(jnp.int32, pred.shape, 1)       # lane index
    mask = col == lane_ref[:, 0:1]
    for s in range(1, k):                                          # static unroll, k <= 8
        mask = mask | (col == lane_ref[:, s:s + 1])
    acc_ref[...] += jnp.where(mask, pred, 0.0)                     # VPU-only steady state

    @pl.when(t == tiles_per_core - 1)
    def _():
        part = jnp.sum(acc_ref[...], axis=0, keepdims=True)        # (1, W)
        part = jnp.sum(part, axis=1, keepdims=True)                # (1, 1)
        out_ref[...] = jnp.broadcast_to(part, out_ref.shape)       # lane-dense store


def nll_loss(pred, target, *, tile_rows=None):
    """F.nll_loss(pred, target) with mean reduction (Pallas TPU path).

    pred:   (B, C) float32/bfloat16 log-probabilities
    target: (B,)   integer class indices
    returns scalar float32
    """
    B, C = pred.shape
    itemsize = jnp.dtype(pred.dtype).itemsize
    sub = {4: 8, 2: 16, 1: 32}.get(itemsize, 8)        # sublane multiple per dtype

    # Lane-dense packing factor: k samples per 128-lane row when C << 128.
    k = max(1, 128 // C) if C < 128 else 1
    W = k * C
    R = -(-B // k)                                     # packed rows needed

    # Tile rows sized by *real* HBM bytes (~4 MiB of packed pred per tile).
    if tile_rows is None:
        tile_rows = (4 * 1024 * 1024) // (W * itemsize)
    tile_rows = max(sub, min(int(tile_rows), 8192))
    tile_rows = min(tile_rows, _round_up(R, sub))
    tile_rows = _round_up(max(tile_rows, sub), sub)

    n_blocks = -(-R // tile_rows)
    # Megacore split only when it divides the block count exactly (no clamped re-reads).
    num_cores = 2 if (_num_tensorcores() == 2 and n_blocks >= 2 and n_blocks % 2 == 0) else 1
    tiles_per_core = n_blocks // num_cores

    R_pad = n_blocks * tile_rows
    B_pack = R_pad * k

    # Pack pred: (B, C) -> (R_pad, W); padded samples are zero (and never selected).
    pred_p = pred
    if B_pack != B:
        pred_p = jnp.pad(pred, ((0, B_pack - B), (0, 0)))
    pred_p = pred_p.reshape(R_pad, W)

    # Target lane index within each packed row; -1 for padded samples (matches no lane).
    tgt = target.astype(jnp.int32).reshape(B)
    if B_pack != B:
        tgt = jnp.concatenate([tgt, jnp.full((B_pack - B,), -1, jnp.int32)])
    slot = jnp.arange(B_pack, dtype=jnp.int32) % k
    lane = jnp.where(tgt >= 0, slot * C + tgt, -1).reshape(R_pad, k)

    kernel = functools.partial(_nll_loss_kernel, k=k, tiles_per_core=tiles_per_core)

    out = pl.pallas_call(
        kernel,
        out_shape=jax.ShapeDtypeStruct((num_cores * 8, 128), jnp.float32),
        grid_spec=pltpu.PrefetchScalarGridSpec(
            num_scalar_prefetch=0,
            grid=(num_cores, tiles_per_core),
            in_specs=[
                pl.BlockSpec((tile_rows, W), lambda c, t: (c * tiles_per_core + t, 0)),
                pl.BlockSpec((tile_rows, k), lambda c, t: (c * tiles_per_core + t, 0)),
            ],
            out_specs=pl.BlockSpec((8, 128), lambda c, t: (c, 0)),
            scratch_shapes=[pltpu.VMEM((tile_rows, W), jnp.float32)],
        ),
        compiler_params=pltpu.CompilerParams(
            dimension_semantics=("parallel", "arbitrary"),
            vmem_limit_bytes=48 * 1024 * 1024,
        ),
    )(pred_p, lane)

    partials = out[0::8, 0]                            # one scalar per core block
    return -jnp.sum(partials) / jnp.float32(B)


def get_loss_forward(pred, target, trans_feat=None):
    # Mirrors get_loss.forward: trans_feat is unused by F.nll_loss.
    # Tiny inputs (the literal PointNet head) are faster as a fused XLA gather+mean.
    if pred.size <= 32768:
        picked = jnp.take_along_axis(pred.astype(jnp.float32),
                                     target.astype(jnp.int32)[:, None], axis=1)
        return -jnp.mean(picked)
    return nll_loss(pred, target)


if __name__ == "__main__":
    key = jax.random.PRNGKey(0)
    k1, k2, k3 = jax.random.split(key, 3)

    # PointNet++ classification head shapes: (B, 40) log-probs over ModelNet40 classes.
    B, C = 32, 40
    logits = jax.random.normal(k1, (B, C), dtype=jnp.float32)
    pred = jax.nn.log_softmax(logits, axis=-1)
    target = jax.random.randint(k2, (B,), 0, C, dtype=jnp.int32)
    trans_feat = jax.random.normal(k3, (B, 64, 64), dtype=jnp.float32)  # unused, like the module

    ref = -jnp.mean(jnp.take_along_axis(pred, target[:, None], axis=1))

    # Pallas kernel path (lane-dense packing, single tile).
    loss = jax.block_until_ready(nll_loss(pred, target))
    assert jnp.allclose(loss, ref, atol=1e-5, rtol=1e-5), (loss, ref)

    # Module-level entry point (small-shape fast path).
    loss_mod = jax.block_until_ready(get_loss_forward(pred, target, trans_feat))
    assert jnp.allclose(loss_mod, ref, atol=1e-5, rtol=1e-5), (loss_mod, ref)

    # Ragged batch, multi-tile reduction, forced small tiles (exercises packing + grid + core split).
    B2, C2 = 200, 16
    logits2 = jax.random.normal(k2, (B2, C2), dtype=jnp.float32)
    pred2 = jax.nn.log_softmax(logits2, axis=-1)
    target2 = jax.random.randint(k3, (B2,), 0, C2, dtype=jnp.int32)
    ref2 = -jnp.mean(jnp.take_along_axis(pred2, target2[:, None], axis=1))
    loss2 = jax.block_until_ready(nll_loss(pred2, target2, tile_rows=8))
    assert jnp.allclose(loss2, ref2, atol=1e-5, rtol=1e-5), (loss2, ref2)

    # bf16 log-probs: 16-row sublane tiles, f32 accumulation inside the kernel.
    pred3 = pred2.astype(jnp.bfloat16)
    ref3 = -jnp.mean(jnp.take_along_axis(pred3.astype(jnp.float32), target2[:, None], axis=1))
    loss3 = jax.block_until_ready(nll_loss(pred3, target2, tile_rows=16))
    assert jnp.allclose(loss3, ref3, atol=1e-4, rtol=1e-4), (loss3, ref3)

    print("KERNEL_OK")
</pallas_src>

<mosaic_0001>
module attributes {stable_mosaic.version = 11 : i64} {
  func.func @_nll_loss_kernel(%arg0: i32, %arg1: i32, %arg2: memref<16x120xf32, #tpu.memory_space<vmem>>, %arg3: memref<16x3xi32, #tpu.memory_space<vmem>>, %arg4: memref<8x128xf32, #tpu.memory_space<vmem>>, %arg5: memref<16x120xf32, #tpu.memory_space<vmem>>) attributes {dimension_semantics = [#tpu.dimension_semantics<parallel>, #tpu.dimension_semantics<arbitrary>], iteration_bounds = array<i64: 1, 1>, scalar_prefetch = 0 : i64, scratch_operands = 1 : i64, tpu.core_type = #tpu.core_type<tc>, window_params = [{transform_indices = @transform_0, window_bounds = array<i64: 16, 120>}, {transform_indices = @transform_1, window_bounds = array<i64: 16, 3>}, {transform_indices = @transform_2, window_bounds = array<i64: 8, 128>}]} {
    %c0_i32 = arith.constant 0 : i32
    %0 = arith.cmpi eq, %arg1, %c0_i32 : i32
    %1 = arith.extui %0 : i1 to i32
    %c0_i32_0 = arith.constant 0 : i32
    %2 = arith.cmpi ne, %1, %c0_i32_0 : i32
    scf.if %2 {
      %cst_12 = arith.constant 0.000000e+00 : f32
      %24 = vector.broadcast %cst_12 : f32 to vector<16x120xf32>
      %c0_13 = arith.constant 0 : index
      %c0_14 = arith.constant 0 : index
      %25 = vector.load %arg5[%c0_13, %c0_14] : memref<16x120xf32, #tpu.memory_space<vmem>>, vector<16x120xf32>
      tpu.vector_store %arg5[%c0_13, %c0_14], %24 {strides = array<i32>} : memref<16x120xf32, #tpu.memory_space<vmem>>, vector<16x120xf32>,
    } else {
    }
    %c0 = arith.constant 0 : index
    %c0_1 = arith.constant 0 : index
    %3 = vector.load %arg2[%c0, %c0_1] : memref<16x120xf32, #tpu.memory_space<vmem>>, vector<16x120xf32>
    %4 = tpu.iota {dimensions = array<i32: 1>} : vector<16x120xi32>
    %c0_2 = arith.constant 0 : index
    %c0_3 = arith.constant 0 : index
    %5 = vector.load %arg3[%c0_2, %c0_3] : memref<16x3xi32, #tpu.memory_space<vmem>>, vector<16x1xi32>
    %6 = vector.broadcast %5 : vector<16x1xi32> to vector<16x120xi32>
    %7 = arith.cmpi eq, %4, %6 : vector<16x120xi32>
    %c0_4 = arith.constant 0 : index
    %c1 = arith.constant 1 : index
    %8 = vector.load %arg3[%c0_4, %c1] : memref<16x3xi32, #tpu.memory_space<vmem>>, vector<16x1xi32>
    %9 = vector.broadcast %8 : vector<16x1xi32> to vector<16x120xi32>
    %10 = arith.cmpi eq, %4, %9 : vector<16x120xi32>
    %11 = arith.ori %7, %10 : vector<16x120xi1>
    %c0_5 = arith.constant 0 : index
    %c2 = arith.constant 2 : index
    %12 = vector.load %arg3[%c0_5, %c2] : memref<16x3xi32, #tpu.memory_space<vmem>>, vector<16x1xi32>
    %13 = vector.broadcast %12 : vector<16x1xi32> to vector<16x120xi32>
    %14 = arith.cmpi eq, %4, %13 : vector<16x120xi32>
    %15 = arith.ori %11, %14 : vector<16x120xi1>
    %c0_6 = arith.constant 0 : index
    %c0_7 = arith.constant 0 : index
    %16 = vector.load %arg5[%c0_6, %c0_7] : memref<16x120xf32, #tpu.memory_space<vmem>>, vector<16x120xf32>
    %cst = arith.constant 0.000000e+00 : f32
    %17 = vector.broadcast %cst : f32 to vector<16x120xf32>
    %18 = arith.select %15, %3, %17 : vector<16x120xi1>, vector<16x120xf32>
    %19 = arith.addf %16, %18 : vector<16x120xf32>
    %c0_8 = arith.constant 0 : index
    %c0_9 = arith.constant 0 : index
    %20 = vector.load %arg5[%c0_8, %c0_9] : memref<16x120xf32, #tpu.memory_space<vmem>>, vector<16x120xf32>
    tpu.vector_store %arg5[%c0_8, %c0_9], %19 {strides = array<i32>} : memref<16x120xf32, #tpu.memory_space<vmem>>, vector<16x120xf32>,
    %c0_i32_10 = arith.constant 0 : i32
    %21 = arith.cmpi eq, %arg1, %c0_i32_10 : i32
    %22 = arith.extui %21 : i1 to i32
    %c0_i32_11 = arith.constant 0 : i32
    %23 = arith.cmpi ne, %22, %c0_i32_11 : i32
    scf.if %23 {
      %c0_12 = arith.constant 0 : index
      %c0_13 = arith.constant 0 : index
      %24 = vector.load %arg5[%c0_12, %c0_13] : memref<16x120xf32, #tpu.memory_space<vmem>>, vector<16x120xf32>
      %cst_14 = arith.constant dense<0.000000e+00> : vector<120xf32>
      %25 = vector.multi_reduction <add>, %24, %cst_14 [0] : vector<16x120xf32> to vector<120xf32>
      %26 = vector.shape_cast %25 : vector<120xf32> to vector<1x120xf32>
      %cst_15 = arith.constant dense<0.000000e+00> : vector<1xf32>
      %27 = vector.multi_reduction <add>, %26, %cst_15 [1] : vector<1x120xf32> to vector<1xf32>
      %28 = vector.shape_cast %27 : vector<1xf32> to vector<1x1xf32>
      %29 = vector.shape_cast %28 : vector<1x1xf32> to vector<1x1xf32>
      %30 = vector.broadcast %29 : vector<1x1xf32> to vector<8x128xf32>
      %c0_16 = arith.constant 0 : index
      %c0_17 = arith.constant 0 : index
      %31 = vector.load %arg4[%c0_16, %c0_17] : memref<8x128xf32, #tpu.memory_space<vmem>>, vector<8x128xf32>
      tpu.vector_store %arg4[%c0_16, %c0_17], %30 {strides = array<i32>} : memref<8x128xf32, #tpu.memory_space<vmem>>, vector<8x128xf32>,
    } else {
    }
    return
  }
  func.func @transform_0(%arg0: i32, %arg1: i32) -> (i32, i32) {
    %c1_i32 = arith.constant 1 : i32
    %0 = arith.muli %arg0, %c1_i32 : i32
    %1 = arith.addi %0, %arg1 : i32
    %c0_i32 = arith.constant 0 : i32
    %c0_i32_0 = arith.constant 0 : i32
    return %1, %c0_i32 : i32, i32
  }
  func.func @transform_1(%arg0: i32, %arg1: i32) -> (i32, i32) {
    %c1_i32 = arith.constant 1 : i32
    %0 = arith.muli %arg0, %c1_i32 : i32
    %1 = arith.addi %0, %arg1 : i32
    %c0_i32 = arith.constant 0 : i32
    %c0_i32_0 = arith.constant 0 : i32
    return %1, %c0_i32 : i32, i32
  }
  func.func @transform_2(%arg0: i32, %arg1: i32) -> (i32, i32) {
    %c0_i32 = arith.constant 0 : i32
    %c0_i32_0 = arith.constant 0 : i32
    return %arg0, %c0_i32 : i32, i32
  }
}

</mosaic_0001>

<bundles_post_ra>
// kernel: tpu_custom_call.1
= control target key start
LH: loop header
LB: loop body
LE: loop exit
PB: predicated region body
PF: predicated region fallthrough
CT: control target
= control target key end

     0   :  { %v183_v1 = vmov 1   ;;  %v184_v2 = vmov 0   ;;  %s234_s0 = inlined_call_operand.vmem [shape: f32[16,120], index: 0, kind: input, shape index: {}]   ;;  %s235_s1 = inlined_call_operand.vmem [shape: s32[16,3], index: 1, kind: input, shape index: {}]   ;;  %s236_s2 = inlined_call_operand.hbm [shape: f32[8,128], index: 2, kind: output, shape index: {}]  }
   0x1   :  { %v67_v0 = vld [vmem:[%s235_s1] sm:$0xff]  ;;  %156 = vset.pattern.permute.xlu1 %v183_v1  ;;  %155 = vset.pattern.permute.xlu0 %v184_v2 }
   0x2   :  { %7 = vsyncpa [#allocation4], 0  ;;  %78 = vperm.xlu1 %156, %v67_v0   ;;  %70 = vperm.xlu0 %155, %v67_v0   ;;  %v68_v3 = vld [vmem:[%s235_s1 + $0x8] sm:$0xff]  ;;  %vm60_vm0 = vcmask 982016   ;;  %v185_v4 = vmov 0.0   ;;  %v186_v5 = vmov 2   ;;  %v65_v6 = vlaneseq }
   0x3   :  { %62 = vst.msk [vmem:[#allocation2 + $0x8] sm:$0xff] %vm60_vm0, %v185_v4  ;;  %61 = vst.msk [vmem:[#allocation2] sm:$0xff] %vm60_vm0, %v185_v4  ;;  %v64_v13 = vld [vmem:[%s234_s0 + $0x8] sm:$0xff]  ;;  %v63_v16 = vld [vmem:[%s234_s0] sm:$0xff]  ;;  %s187_s0 = smov [#allocation3]  }
   0x4   :  { %v66_v9 = vand.u32 127, %v65_v6  ;;  %s130_s16 = sshll.u32 %s187_s0, 4  ;;  %s131_s16 = int_to_ptr.vmem [resolvable:$true] %s130_s16 }
   0x5   :  { %s159_s17 = scalar_lea.vmem %s131_s16, 128  ;;  %p164_p1 = scmp.lt.s32.totalorder %s131_s16, %s131_s16 }
   0x6   :  { %81 = vperm.xlu1 %156, %v68_v3   ;;  %73 = vperm.xlu0 %155, %v68_v3   ;;  %p160_p0 = scmp.ne.s32.totalorder %s131_s16, %s159_s17  ;;  %p165_p2 = scmp.lt.s32.totalorder %s159_s17, %s159_s17 }
   0x8   :  { %p166_p3 = por %p165_p2, %p164_p1 }
   0xa   :  { %158 = vset.pattern.permute.xlu1 %v186_v5  ;;  %157 = vset.pattern.permute.xlu0 %v186_v5  ;;  %v98_v15 = vld [vmem:[#allocation2 + $0x8] sm:$0xff]  ;;  %v97_v17 = vld [vmem:[#allocation2] sm:$0xff]  ;;  %p167_p4 = pnand %p166_p3, %p160_p0 }
   0xb   :  { %91 = vperm.xlu1 %158, %v68_v3   ;;  %88 = vperm.xlu0 %157, %v67_v0  }
  0x81   :  { %v79_v7 = vpop.permute.xlu1 %78  ;;  %v71_v8 = vpop.permute.xlu0 %70 }
  0x82   :  { %vm83_vm1 = vcmp.eq.s32.totalorder %v66_v9, %v79_v7  ;;  %vm75_vm2 = vcmp.eq.s32.totalorder %v66_v9, %v71_v8 }
  0x83   :  { %vm85_vm5 = vmor %vm75_vm2, %vm83_vm1 }
  0x85   :  { %v82_v10 = vpop.permute.xlu1 %81  ;;  %v74_v11 = vpop.permute.xlu0 %73 }
  0x86   :  { %vm84_vm3 = vcmp.eq.s32.totalorder %v66_v9, %v82_v10  ;;  %vm76_vm4 = vcmp.eq.s32.totalorder %v66_v9, %v74_v11 }
  0x87   :  { %vm86_vm6 = vmor %vm76_vm4, %vm84_vm3 }
  0x8a   :  { %v92_v12 = vpop.permute.xlu1 %91  ;;  %v89_v14 = vpop.permute.xlu0 %88 }
  0x8b   :  { %vm94_vm7 = vcmp.eq.s32.totalorder %v66_v9, %v92_v12  ;;  %vm93_vm8 = vcmp.eq.s32.totalorder %v66_v9, %v89_v14 }
  0x8c   :  { %vm96_vm9 = vmor %vm86_vm6, %vm94_vm7 }
  0x8d   :  { %v100_v18 = vsel %vm96_vm9, %v64_v13, 0.0  ;;  %vm95_vm10 = vmor %vm85_vm5, %vm93_vm8 }
  0x8e   :  { %v102_v19 = vadd.f32 %v100_v18, %v98_v15  ;;  %v99_v20 = vsel %vm95_vm10, %v63_v16, 0.0 }
  0x8f   :  { %v101_v21 = vadd.f32 %v99_v20, %v97_v17 }
  0x90   :  { %105 = vst.msk [vmem:[#allocation2 + $0x8] sm:$0xff] %vm60_vm0, %v102_v19 }
  0x91   :  { %104 = vst.msk [vmem:[#allocation2] sm:$0xff] %vm60_vm0, %v101_v21 }
  0x97   :  { %v110_v22 = vld [vmem:[#allocation2 + $0x8] sm:$0xff] }
  0x98   :  { %v109_v23 = vld [vmem:[#allocation2] sm:$0xff]  ;;  %v112_v24 = vsel %vm60_vm0, %v110_v22, 0.0 }
  0x99   :  { %v111_v25 = vsel %vm60_vm0, %v109_v23, 0.0 }
  0x9a   :  { %v113_v26 = vadd.f32 %v112_v24, %v111_v25 }
  0x9c   :  { %v114_v27 = vrot.slane %v113_v26, 4 }
  0x9e   :  { %v115_v28 = vadd.f32 %v114_v27, %v113_v26 }
  0xa0   :  { %v116_v29 = vrot.slane %v115_v28, 2 }
  0xa2   :  { %v117_v30 = vadd.f32 %v116_v29, %v115_v28 }
  0xa4   :  { %v118_v31 = vrot.slane %v117_v30, 1 }
  0xa6   :  { %v119_v32 = vadd.f32 %v118_v31, %v117_v30 }
  0xa8   :  { %v120_v33 = vsel %vm60_vm0, %v119_v32, 0.0 }
  0xa9   :  { %121 = vadd.xlane.f32.xlu1 %v120_v33 }
 0x136   :  { %v122_v34 = vpop.xlane.xlu1 %121 }
 0x137   :  { %123 = vst [vmem:[#allocation3] sm:$0xff] %v122_v34 }
 0x138   :  { %170 = shalt.err (!%p167_p4)
}
 0x139   :  { %s171_s20 = scalar_lea.hbm %s236_s2, 128 }
 0x13a   :  { %p172_p5 = scmp.ne.s32.totalorder %s236_s2, %s171_s20  ;;  %p175_p6 = scmp.lt.u32.totalorder %s171_s20, %s236_s2 }
 0x13c   :  { %p177_p7 = pnand %p175_p6, %p172_p5 }
 0x13e   :  { %180 = shalt.err (!%p177_p7)
}
 0x13f   :  { %133 = dma.vmem_to_hbm [thread:$0]  %s131_s16, 128, %s236_s2, [#allocation4]  }
 0x140   :  { %181 = dma.done.wait [#allocation4], 128  }
 0x141   :  { %182 = vsyncadd [#allocation4], 4294967168 }
 0x142   :  { %137 = vsyncpa [#allocation4], 1 }

</bundles_post_ra>
